<compile_context>
chip_gen: v5e
topology: v5e:2x2
jax: 0.10.0
libtpu: 0.0.40
codegen_flags: <defaults>
</compile_context>

<pallas_src>
import functools

import jax
import jax.numpy as jnp
from jax.experimental import pallas as pl
from jax.experimental.pallas import tpu as pltpu


# Stay inside v7x's 64 MiB/TC while raising the 32 MiB scoped default that
# leaves half of v5e/v6e's 128 MiB unused.
_VMEM_LIMIT_BYTES = 48 * 1024 * 1024
# Per-kernel budget (bytes, before pipeline double-buffering) for keeping the
# dense XW1 / HW2 operand fully VMEM-resident instead of re-streaming it.
_RESIDENT_BYTES = 8 * 1024 * 1024


# ---------------------------------------------------------------------------
# kernels
# ---------------------------------------------------------------------------

def _linear_kernel(x_ref, w_ref, out_ref):
    """One row-tile of X @ W (bf16 operands, f32 MXU accumulation)."""
    out_ref[...] = jnp.dot(
        x_ref[...], w_ref[...], preferred_element_type=jnp.float32
    ).astype(out_ref.dtype)


def _gcn_layer1_kernel(a_ref, xw_ref, b_ref, w2_ref, out_ref, acc_ref,
                       *, tile, resident):
    """HW2 = relu(A_hat @ XW1 + b1) @ W2 for one row-tile (k = reduction)."""
    k = pl.program_id(1)

    @pl.when(k == 0)
    def _init():
        acc_ref[...] = jnp.zeros_like(acc_ref)

    if resident:
        # XW1 is fully resident in VMEM; slice the k-block in-kernel.
        xw_blk = xw_ref[pl.ds(pl.multiple_of(k * tile, tile), tile), :]
    else:
        xw_blk = xw_ref[...]

    acc_ref[...] += jnp.dot(
        a_ref[...], xw_blk, preferred_element_type=jnp.float32
    )

    @pl.when(k == pl.num_programs(1) - 1)
    def _finalize():
        # ReLU epilogue in f32, cast to bf16 for a single-pass MXU matmul.
        h = jnp.maximum(acc_ref[...] + b_ref[...], 0.0).astype(jnp.bfloat16)
        hw2 = jnp.dot(h, w2_ref[...], preferred_element_type=jnp.float32)
        out_ref[...] = hw2.astype(out_ref.dtype)


def _gcn_layer2_kernel(a_ref, hw_ref, b_ref, out_ref, acc_ref,
                       *, tile, resident):
    """out = A_hat @ HW2 + b2 for one row-tile (k = reduction axis)."""
    k = pl.program_id(1)

    @pl.when(k == 0)
    def _init():
        acc_ref[...] = jnp.zeros_like(acc_ref)

    if resident:
        hw_blk = hw_ref[pl.ds(pl.multiple_of(k * tile, tile), tile), :]
    else:
        hw_blk = hw_ref[...]

    acc_ref[...] += jnp.dot(
        a_ref[...], hw_blk, preferred_element_type=jnp.float32
    )

    @pl.when(k == pl.num_programs(1) - 1)
    def _finalize():
        out_ref[...] = (acc_ref[...] + b_ref[...]).astype(out_ref.dtype)


# ---------------------------------------------------------------------------
# glue (plain JAX): padded normalized adjacency, padding helpers
# ---------------------------------------------------------------------------

def build_normalized_adjacency_padded(edge_index, num_nodes, n_pad):
    """A_hat = D^-1/2 (A + I) D^-1/2 (PyG GCNConv convention), scattered
    directly into an (n_pad, n_pad) buffer and cast once to bf16."""
    src = edge_index[0].astype(jnp.int32)
    dst = edge_index[1].astype(jnp.int32)
    # deg[i] = 1 (self loop) + #incoming edges to i (duplicates summed),
    # i.e. row-sums of (A + I) with A[dst, src] += 1.
    deg = jnp.ones((num_nodes,), jnp.float32).at[dst].add(
        jnp.ones(dst.shape, jnp.float32))
    dinv = jnp.where(deg > 0.0, jax.lax.rsqrt(deg), 0.0)
    a = jnp.zeros((n_pad, n_pad), jnp.float32)
    a = a.at[dst, src].add(dinv[dst] * dinv[src])
    idx = jnp.arange(num_nodes, dtype=jnp.int32)
    a = a.at[idx, idx].add(dinv * dinv)
    return a.astype(jnp.bfloat16)


def _round_up(x, m):
    return ((x + m - 1) // m) * m


def _choose_tile(n):
    """Pick the A tile first (then pad N to a multiple of it)."""
    if n <= 128:
        return 128
    if n <= 256:
        return 256
    if n <= 2048:
        return 512          # ~85% of HBM roofline, 1 MiB double-buffered A
    return 1024              # 4 MiB double-buffered A, fine in 48 MiB budget


def _pad2d(x, rows, cols, dtype):
    out = jnp.zeros((rows, cols), dtype)
    return out.at[: x.shape[0], : x.shape[1]].set(x.astype(dtype))


# ---------------------------------------------------------------------------
# forward
# ---------------------------------------------------------------------------

def gnn_encoder_forward(x, edge_index, params):
    """x: [N, Cin] float32, edge_index: [2, E] int32 -> [N, out_channels] f32."""
    n, cin = x.shape
    w1, b1, w2, b2 = params["w1"], params["b1"], params["w2"], params["b2"]
    hid = w1.shape[1]
    cout = w2.shape[1]

    # ---- tile first, then pad (lane-dense shapes, no 128-tile fallback) ----
    tile = _choose_tile(n)
    n_pad = _round_up(n, tile)
    cin_p = _round_up(cin, 128)
    hid_p = _round_up(hid, 128)
    cout_p = _round_up(cout, 128)
    n_row = n_pad // tile
    n_col = n_pad // tile

    # ---- operands: A_hat streamed bf16, X/W bf16, biases f32 ----
    a_pad = build_normalized_adjacency_padded(edge_index, n, n_pad)
    x_pad = _pad2d(x, n_pad, cin_p, jnp.bfloat16)
    w1_p = _pad2d(w1, cin_p, hid_p, jnp.bfloat16)
    w2_p = _pad2d(w2, hid_p, cout_p, jnp.bfloat16)
    b1_p = jnp.zeros((1, hid_p), jnp.float32).at[0, :hid].set(b1)
    b2_p = jnp.zeros((1, cout_p), jnp.float32).at[0, :cout].set(b2)

    # keep XW1 / HW2 VMEM-resident when they fit the budget
    resident1 = n_pad * hid_p * 2 <= _RESIDENT_BYTES
    resident2 = n_pad * cout_p * 2 <= _RESIDENT_BYTES

    cp_1d = pltpu.CompilerParams(
        dimension_semantics=("parallel",),
        vmem_limit_bytes=_VMEM_LIMIT_BYTES,
    )
    cp_2d = pltpu.CompilerParams(
        dimension_semantics=("parallel", "arbitrary"),
        vmem_limit_bytes=_VMEM_LIMIT_BYTES,
    )

    # ---- kernel 1: XW1 = X @ W1 (hoisted feature transform, bf16 in) ----
    xw1 = pl.pallas_call(
        _linear_kernel,
        out_shape=jax.ShapeDtypeStruct((n_pad, hid_p), jnp.bfloat16),
        grid=(n_row,),
        in_specs=[
            pl.BlockSpec((tile, cin_p), lambda i: (i, 0)),
            pl.BlockSpec((cin_p, hid_p), lambda i: (0, 0)),
        ],
        out_specs=pl.BlockSpec((tile, hid_p), lambda i: (i, 0)),
        compiler_params=cp_1d,
    )(x_pad, w1_p)

    # ---- kernel 2: HW2 = relu(A_hat @ XW1 + b1) @ W2 (fused epilogue) ----
    if resident1:
        xw_spec = pl.BlockSpec((n_pad, hid_p), lambda i, k: (0, 0))   # resident
    else:
        xw_spec = pl.BlockSpec((tile, hid_p), lambda i, k: (k, 0))    # streamed

    hw2 = pl.pallas_call(
        functools.partial(_gcn_layer1_kernel, tile=tile, resident=resident1),
        out_shape=jax.ShapeDtypeStruct((n_pad, cout_p), jnp.bfloat16),
        grid=(n_row, n_col),
        in_specs=[
            pl.BlockSpec((tile, tile), lambda i, k: (i, k)),          # A_hat tile
            xw_spec,                                                  # XW1
            pl.BlockSpec((1, hid_p), lambda i, k: (0, 0)),            # b1
            pl.BlockSpec((hid_p, cout_p), lambda i, k: (0, 0)),       # W2
        ],
        out_specs=pl.BlockSpec((tile, cout_p), lambda i, k: (i, 0)),
        scratch_shapes=[pltpu.VMEM((tile, hid_p), jnp.float32)],
        compiler_params=cp_2d,
    )(a_pad, xw1, b1_p, w2_p)

    # ---- kernel 3: out = A_hat @ HW2 + b2 ----
    if resident2:
        hw_spec = pl.BlockSpec((n_pad, cout_p), lambda i, k: (0, 0))  # resident
    else:
        hw_spec = pl.BlockSpec((tile, cout_p), lambda i, k: (k, 0))   # streamed

    out_pad = pl.pallas_call(
        functools.partial(_gcn_layer2_kernel, tile=tile, resident=resident2),
        out_shape=jax.ShapeDtypeStruct((n_pad, cout_p), jnp.float32),
        grid=(n_row, n_col),
        in_specs=[
            pl.BlockSpec((tile, tile), lambda i, k: (i, k)),          # A_hat tile
            hw_spec,                                                  # HW2
            pl.BlockSpec((1, cout_p), lambda i, k: (0, 0)),           # b2
        ],
        out_specs=pl.BlockSpec((tile, cout_p), lambda i, k: (i, 0)),
        scratch_shapes=[pltpu.VMEM((tile, cout_p), jnp.float32)],
        compiler_params=cp_2d,
    )(a_pad, hw2, b2_p)

    return out_pad[:n, :cout]


def init_params(key, in_channels, hidden_channels, out_channels):
    k1, k2 = jax.random.split(key)
    w1 = jax.random.normal(k1, (in_channels, hidden_channels), jnp.float32) * (
        1.0 / jnp.sqrt(jnp.float32(in_channels))
    )
    w2 = jax.random.normal(k2, (hidden_channels, out_channels), jnp.float32) * (
        1.0 / jnp.sqrt(jnp.float32(hidden_channels))
    )
    b1 = jnp.zeros((hidden_channels,), jnp.float32)
    b2 = jnp.zeros((out_channels,), jnp.float32)
    return {"w1": w1, "b1": b1, "w2": w2, "b2": b2}


if __name__ == "__main__":
    # small, deterministic example
    N = 16            # number of nodes
    IN_C = 8          # in_channels
    HID_C = 32        # hidden_channels
    OUT_C = 16        # out_channels

    key = jax.random.PRNGKey(0)
    kx, ke, kp = jax.random.split(key, 3)

    x = jax.random.normal(kx, (N, IN_C), jnp.float32)

    # deterministic graph: a bidirectional ring plus a few random edges
    ring_src = jnp.arange(N, dtype=jnp.int32)
    ring_dst = (ring_src + 1) % N
    extra_src = jax.random.randint(ke, (8,), 0, N, dtype=jnp.int32)
    extra_dst = (extra_src + 5) % N
    src = jnp.concatenate([ring_src, ring_dst, extra_src])
    dst = jnp.concatenate([ring_dst, ring_src, extra_dst])
    edge_index = jnp.stack([src, dst], axis=0)   # [2, E], E = 40

    params = init_params(kp, IN_C, HID_C, OUT_C)

    out = gnn_encoder_forward(x, edge_index, params)
    jax.block_until_ready(out)

    # pure-JAX reference with matching precision choices (bf16 adjacency,
    # bf16 X/W operands, f32 accumulation) — tolerance reflects bf16 operands.
    a_bf = build_normalized_adjacency_padded(edge_index, N, N)
    x_bf = x.astype(jnp.bfloat16)
    w1_bf = params["w1"].astype(jnp.bfloat16)
    w2_bf = params["w2"].astype(jnp.bfloat16)
    xw1_ref = jnp.dot(x_bf, w1_bf,
                      preferred_element_type=jnp.float32).astype(jnp.bfloat16)
    h_ref = jnp.maximum(
        jnp.dot(a_bf, xw1_ref, preferred_element_type=jnp.float32) + params["b1"],
        0.0,
    ).astype(jnp.bfloat16)
    hw2_ref = jnp.dot(h_ref, w2_bf,
                      preferred_element_type=jnp.float32).astype(jnp.bfloat16)
    out_ref = jnp.dot(a_bf, hw2_ref,
                      preferred_element_type=jnp.float32) + params["b2"]

    assert out.shape == (N, OUT_C)
    max_err = float(jnp.max(jnp.abs(out - out_ref)))
    assert jnp.allclose(out, out_ref, atol=2e-2, rtol=2e-2), max_err

    print("KERNEL_OK")
</pallas_src>

<mosaic_0001>
module attributes {stable_mosaic.version = 11 : i64} {
  func.func @_linear_kernel(%arg0: i32, %arg1: memref<128x128xbf16, #tpu.memory_space<vmem>>, %arg2: memref<128x128xbf16, #tpu.memory_space<vmem>>, %arg3: memref<128x128xbf16, #tpu.memory_space<vmem>>) attributes {dimension_semantics = [#tpu.dimension_semantics<parallel>], iteration_bounds = array<i64: 1>, scalar_prefetch = 0 : i64, scratch_operands = 0 : i64, tpu.core_type = #tpu.core_type<tc>, window_params = [{transform_indices = @transform_0, window_bounds = array<i64: 128, 128>}, {pipeline_mode = #tpu.pipeline_mode<synchronous>, transform_indices = @transform_1, window_bounds = array<i64: 128, 128>}, {transform_indices = @transform_2, window_bounds = array<i64: 128, 128>}]} {
    %c0 = arith.constant 0 : index
    %c0_0 = arith.constant 0 : index
    %0 = vector.load %arg1[%c0, %c0_0] : memref<128x128xbf16, #tpu.memory_space<vmem>>, vector<128x128xbf16>
    %c0_1 = arith.constant 0 : index
    %c0_2 = arith.constant 0 : index
    %1 = vector.load %arg2[%c0_1, %c0_2] : memref<128x128xbf16, #tpu.memory_space<vmem>>, vector<128x128xbf16>
    %cst = arith.constant dense<0.000000e+00> : vector<128x128xf32>
    %2 = tpu.matmul %0, %1, %cst {dimension_numbers = #tpu.dot_dimension_numbers<[1], [0], [0], [1], [0, 0, 1, 1], [], []>} : vector<128x128xbf16>, vector<128x128xbf16>, vector<128x128xf32> -> vector<128x128xf32>
    %3 = arith.truncf %2 : vector<128x128xf32> to vector<128x128xbf16>
    %c0_3 = arith.constant 0 : index
    %c0_4 = arith.constant 0 : index
    %4 = vector.load %arg3[%c0_3, %c0_4] : memref<128x128xbf16, #tpu.memory_space<vmem>>, vector<128x128xbf16>
    tpu.vector_store %arg3[%c0_3, %c0_4], %3 {strides = array<i32>} : memref<128x128xbf16, #tpu.memory_space<vmem>>, vector<128x128xbf16>,
    return
  }
  func.func @transform_0(%arg0: i32) -> (i32, i32) {
    %c0_i32 = arith.constant 0 : i32
    %c0_i32_0 = arith.constant 0 : i32
    return %arg0, %c0_i32 : i32, i32
  }
  func.func @transform_1(%arg0: i32) -> (i32, i32) {
    %c0_i32 = arith.constant 0 : i32
    %c0_i32_0 = arith.constant 0 : i32
    %c0_i32_1 = arith.constant 0 : i32
    return %c0_i32, %c0_i32_0 : i32, i32
  }
  func.func @transform_2(%arg0: i32) -> (i32, i32) {
    %c0_i32 = arith.constant 0 : i32
    %c0_i32_0 = arith.constant 0 : i32
    return %arg0, %c0_i32 : i32, i32
  }
}

</mosaic_0001>

<bundles_post_ra>
// kernel: tpu_custom_call.1
= control target key start
LH: loop header
LB: loop body
LE: loop exit
PB: predicated region body
PF: predicated region fallthrough
CT: control target
= control target key end

     0   :  { %7 = vsyncpa [#allocation3], 0  ;;  %s545_s0 = inlined_call_operand.hbm [shape: bf16[128,128], index: 0, kind: input, shape index: {}]   ;;  %s546_s1 = inlined_call_operand.hbm [shape: bf16[128,128], index: 1, kind: input, shape index: {}]   ;;  %s547_s2 = inlined_call_operand.hbm [shape: bf16[128,128], index: 2, kind: output, shape index: {}]  }
   0x1   :  { %8 = vsyncpa [#allocation6], 0 }
   0x2   :  { %9 = vsyncpa [#allocation4], 0  ;;  %s14_s11 = sshll.u32 %s545_s0, 4  ;;  %s507_s12 = smov [#allocation2]   ;;  %s15_s11 = int_to_ptr.hbm [resolvable:$true] %s14_s11 }
   0x3   :  { %s16_s13 = sshll.u32 %s507_s12, 4  ;;  %s27_s16 = sshll.u32 %s546_s1, 4  ;;  %s17_s13 = int_to_ptr.vmem [resolvable:$true] %s16_s13  ;;  %s28_s16 = int_to_ptr.hbm [resolvable:$true] %s27_s16 }
   0x4   :  { %s508_s17 = smov 64   ;;  %s509_s18 = smov 4  }
   0x5   :  { %22 = dma.hbm_to_vmem [thread:$0]  %s15_s11, 1024, %s17_s13, [#allocation3], %s508_s17, %s508_s17, %s509_s18  }
   0x6   :  { %s510_s19 = smov [#allocation5]  }
   0x7   :  { %s29_s20 = sshll.u32 %s510_s19, 4  ;;  %s30_s20 = int_to_ptr.vmem [resolvable:$true] %s29_s20 }
   0x8   :  { %35 = dma.hbm_to_vmem [thread:$0]  %s28_s16, 1024, %s30_s20, [#allocation6], %s508_s17, %s508_s17, %s509_s18  }
   0x9   :  { %501 = dma.done.wait [#allocation3], 1024  }
   0xa   :  { %502 = vsyncadd [#allocation3], 4294966272 }
   0xb   :  { %503 = dma.done.wait [#allocation6], 1024  }
   0xc   :  { %504 = vsyncadd [#allocation6], 4294966272  ;;  %v352_v0 = vld [vmem:[#allocation5 + $0x38] sm:$0xff]  ;;  %v351_v1 = vld [vmem:[#allocation5 + $0x30] sm:$0xff]  ;;  %s511_s0 = smov [#allocation7]   ;;  %s259_s23 = sshll.u32 %s547_s2, 4  ;;  %s260_s23 = int_to_ptr.hbm [resolvable:$true] %s259_s23 }
   0xd   :  { %172 = vmatpush.bf16.msra.mxu0 %v352_v0  ;;  %400 = vmatpush.bf16.msra.mxu1 %v352_v0  ;;  %v350_v2 = vld [vmem:[#allocation5 + $0x28] sm:$0xff]  ;;  %v349_v3 = vld [vmem:[#allocation5 + $0x20] sm:$0xff]  ;;  %v348_v4 = vld [vmem:[#allocation5 + $0x18] sm:$0xff]  ;;  %s257_s1 = sshll.u32 %s511_s0, 4  ;;  %s258_s1 = int_to_ptr.vmem [resolvable:$true] %s257_s1 }
   0xe   :  { %401 = vmatpush.bf16.msra.mxu2 %v352_v0  ;;  %402 = vmatpush.bf16.msra.mxu3 %v352_v0  ;;  %v347_v5 = vld [vmem:[#allocation5 + $0x10] sm:$0xff]  ;;  %v346_v6 = vld [vmem:[#allocation5 + $0x8] sm:$0xff]  ;;  %v345_v7 = vld [vmem:[#allocation5] sm:$0xff] }
   0xf   :  { %v337_v8 = vld [vmem:[#allocation2] sm:$0xff]  ;;  %v339_v9 = vld [vmem:[#allocation2 + $0x10] sm:$0xff]  ;;  %v338_v12 = vld [vmem:[#allocation2 + $0x8] sm:$0xff] }
  0x10   :  { %v341_v10 = vld [vmem:[#allocation2 + $0x20] sm:$0xff]  ;;  %v343_v11 = vld [vmem:[#allocation2 + $0x30] sm:$0xff]  ;;  %v340_v13 = vld [vmem:[#allocation2 + $0x18] sm:$0xff] }
  0x11   :  { %173 = vmatpush.bf16.msra.mxu0 %v351_v1  ;;  %403 = vmatpush.bf16.msra.mxu1 %v351_v1  ;;  %v342_v14 = vld [vmem:[#allocation2 + $0x28] sm:$0xff]  ;;  %v344_v15 = vld [vmem:[#allocation2 + $0x38] sm:$0xff] }
  0x12   :  { %404 = vmatpush.bf16.msra.mxu2 %v351_v1  ;;  %405 = vmatpush.bf16.msra.mxu3 %v351_v1 }
  0x15   :  { %174 = vmatpush.bf16.msra.mxu0 %v350_v2  ;;  %406 = vmatpush.bf16.msra.mxu1 %v350_v2 }
  0x16   :  { %407 = vmatpush.bf16.msra.mxu2 %v350_v2  ;;  %408 = vmatpush.bf16.msra.mxu3 %v350_v2 }
  0x19   :  { %175 = vmatpush.bf16.msra.mxu0 %v349_v3  ;;  %409 = vmatpush.bf16.msra.mxu1 %v349_v3 }
  0x1a   :  { %410 = vmatpush.bf16.msra.mxu2 %v349_v3  ;;  %411 = vmatpush.bf16.msra.mxu3 %v349_v3 }
  0x1d   :  { %176 = vmatpush.bf16.msra.mxu0 %v348_v4  ;;  %412 = vmatpush.bf16.msra.mxu1 %v348_v4 }
  0x1e   :  { %413 = vmatpush.bf16.msra.mxu2 %v348_v4  ;;  %414 = vmatpush.bf16.msra.mxu3 %v348_v4 }
  0x21   :  { %177 = vmatpush.bf16.msra.mxu0 %v347_v5  ;;  %415 = vmatpush.bf16.msra.mxu1 %v347_v5 }
  0x22   :  { %416 = vmatpush.bf16.msra.mxu2 %v347_v5  ;;  %417 = vmatpush.bf16.msra.mxu3 %v347_v5 }
  0x25   :  { %178 = vmatpush.bf16.msra.mxu0 %v346_v6  ;;  %418 = vmatpush.bf16.msra.mxu1 %v346_v6 }
  0x26   :  { %419 = vmatpush.bf16.msra.mxu2 %v346_v6  ;;  %420 = vmatpush.bf16.msra.mxu3 %v346_v6 }
  0x29   :  { %179 = vmatpush.bf16.msra.mxu0 %v345_v7  ;;  %421 = vmatpush.bf16.msra.mxu1 %v345_v7 }
  0x2a   :  { %422 = vmatpush.bf16.msra.mxu2 %v345_v7  ;;  %423 = vmatpush.bf16.msra.mxu3 %v345_v7 }
  0x2c   :  { %180 = vmatmul.bf16.vlgmr.msra.gmra.mxu0 %v337_v8  ;;  %190 = vmatmul.bf16.vlgmr.msra.gmra.mxu1 %v339_v9 }
  0x2d   :  { %200 = vmatmul.bf16.vlgmr.msra.gmra.mxu2 %v341_v10  ;;  %210 = vmatmul.bf16.vlgmr.msra.gmra.mxu3 %v343_v11 }
  0x3c   :  { %185 = vmatmul.bf16.gmra.mxu0 %v338_v12  ;;  %195 = vmatmul.bf16.gmra.mxu1 %v340_v13 }
  0x3d   :  { %205 = vmatmul.bf16.gmra.mxu2 %v342_v14  ;;  %215 = vmatmul.bf16.gmra.mxu3 %v344_v15 }
  0xa9   :  { %v181_v16 = vpop.f32.mrf.mxu0  ;;  %v191_v17 = vpop.f32.mrf.mxu1 }
  0xb0   :  { %v201_v18 = vpop.f32.mrf.mxu2  ;;  %v211_v19 = vpop.f32.mrf.mxu3 }
  0xb1   :  { %v183_v20 = vpop.f32.mrf.mxu0  ;;  %v193_v21 = vpop.f32.mrf.mxu1 }
  0xb2   :  { %v356_v22 = vpack.c.bf16 %v183_v20, %v181_v16  ;;  %v366_v23 = vpack.c.bf16 %v193_v21, %v191_v17 }
  0xb4   :  { %357 = vst [vmem:[#allocation7] sm:$0xff] %v356_v22  }
  0xb5   :  { %394 = vst [vmem:[#allocation7 + $0x10] sm:$0xff] %v366_v23  }
  0xb8   :  { %v203_v24 = vpop.f32.mrf.mxu2  ;;  %v213_v25 = vpop.f32.mrf.mxu3 }
  0xb9   :  { %v376_v26 = vpack.c.bf16 %v203_v24, %v201_v18  ;;  %v386_v27 = vpack.c.bf16 %v213_v25, %v211_v19  ;;  %v186_v28 = vpop.f32.mrf.mxu0  ;;  %v196_v29 = vpop.f32.mrf.mxu1 }
  0xbb   :  { %396 = vst [vmem:[#allocation7 + $0x20] sm:$0xff] %v376_v26  }
  0xbc   :  { %398 = vst [vmem:[#allocation7 + $0x30] sm:$0xff] %v386_v27  }
  0xc0   :  { %v206_v30 = vpop.f32.mrf.mxu2  ;;  %v216_v31 = vpop.f32.mrf.mxu3 }
  0xc1   :  { %v188_v32 = vpop.f32.mrf.mxu0  ;;  %v198_v33 = vpop.f32.mrf.mxu1 }
  0xc2   :  { %v361_v34 = vpack.c.bf16 %v188_v32, %v186_v28  ;;  %v371_v35 = vpack.c.bf16 %v198_v33, %v196_v29 }
  0xc4   :  { %393 = vst [vmem:[#allocation7 + $0x8] sm:$0xff] %v361_v34  }
  0xc5   :  { %395 = vst [vmem:[#allocation7 + $0x18] sm:$0xff] %v371_v35  }
  0xc8   :  { %v208_v36 = vpop.f32.mrf.mxu2  ;;  %v218_v37 = vpop.f32.mrf.mxu3 }
  0xc9   :  { %v381_v38 = vpack.c.bf16 %v208_v36, %v206_v30  ;;  %v391_v39 = vpack.c.bf16 %v218_v37, %v216_v31 }
  0xcb   :  { %397 = vst [vmem:[#allocation7 + $0x28] sm:$0xff] %v381_v38  }
  0xcc   :  { %399 = vst [vmem:[#allocation7 + $0x38] sm:$0xff] %v391_v39  }
  0xcd   :  { %265 = dma.vmem_to_hbm [thread:$0]  %s258_s1, 1024, %s260_s23, [#allocation4], %s508_s17, %s508_s17, %s509_s18  }
  0xce   :  { %505 = dma.done.wait [#allocation4], 1024  }
  0xcf   :  { %506 = vsyncadd [#allocation4], 4294966272 }
  0xd0   :  { %270 = vsyncpa [#allocation3], 1 }
  0xd1   :  { %271 = vsyncpa [#allocation6], 1 }
  0xd2   :  { %272 = vsyncpa [#allocation4], 1 }

</bundles_post_ra>
